<compile_context>
chip_gen: v5e
topology: v5e:2x2
jax: 0.10.0
libtpu: 0.0.40
codegen_flags: <defaults>
</compile_context>

<pallas_src>
import numpy as np
import jax
import jax.numpy as jnp
from jax.experimental import pallas as pl
from jax.experimental.pallas import tpu as pltpu

FC1 = 512  # fc1 out_features is fixed at 512 in the module


def _round_up(n, m):
    return ((n + m - 1) // m) * m


def identity_concat_kernel(wx_ref,          # SMEM (1, 1): conv weight on the x column
                           x_ref,           # (Bp, tk)    gene tile of x
                           gbias_ref,       # (1, tk)     per-gene text proj + conv bias
                           w1_ref, b1_ref,  # (tk, 512), (1, 512)
                           w2_ref, b2_ref,  # (512, Hp), (1, Hp)
                           w3_ref, b3_ref,  # (Hp, OUTp), (1, OUTp)
                           o_ref,           # (Bp, OUTp)
                           acc_ref):        # VMEM scratch (Bp, 512) f32 accumulator
    k = pl.program_id(0)

    @pl.when(k == 0)
    def _():
        acc_ref[...] = jnp.zeros_like(acc_ref)

    # conv1 + ReLU: elementwise per gene (VPU); gbias already holds w_t.te[g] + b_conv.
    h = jnp.maximum(wx_ref[0, 0] * x_ref[...] + gbias_ref[...], 0.0)

    # fc1 partial-sum over gene tiles (MXU, f32 accumulation).
    acc_ref[...] += jnp.dot(h.astype(w1_ref.dtype), w1_ref[...],
                            preferred_element_type=jnp.float32)

    # fc2 / fc3 epilogue only on the last gene tile; their weights stay resident.
    @pl.when(k == pl.num_programs(0) - 1)
    def _():
        y1 = jnp.maximum(acc_ref[...] + b1_ref[...], 0.0)                     # (Bp, 512)
        y2 = jnp.dot(y1.astype(w2_ref.dtype), w2_ref[...],
                     preferred_element_type=jnp.float32) + b2_ref[...]
        y2 = jnp.maximum(y2, 0.0)                                             # (Bp, Hp)
        o_ref[...] = (jnp.dot(y2.astype(w3_ref.dtype), w3_ref[...],
                              preferred_element_type=jnp.float32)
                      + b3_ref[...]).astype(o_ref.dtype)                      # (Bp, OUTp)


def prepare_identity_concat(text_embedding, params, *,
                            weight_dtype=jnp.float32, tk_max=2048):
    """One-time host prep: gene mask, weight transposes, padding, text-bias fold."""
    te = np.asarray(text_embedding, dtype=np.float32)                  # (gene_num, T)
    mask = te.sum(axis=1) != 0
    gene_idx = np.nonzero(mask)[0]
    G = int(gene_idx.size)
    # TODO(synk): a data-dependent mask that drops genes produces a dynamic shape the
    # original PyTorch module cannot handle either (fc1.in_features is fixed); assert.
    assert G == np.asarray(params["w1"]).shape[1], \
        "gene mask must keep exactly fc1.in_features genes"
    gather_needed = (G != te.shape[0]) or (not np.array_equal(gene_idx, np.arange(G)))

    conv_w = np.asarray(params["conv_w"], dtype=np.float32).reshape(-1)  # (T+1,)
    w_x = float(conv_w[0])
    w_t = conv_w[1:]                                                     # (T,)
    b_c = float(np.asarray(params["conv_b"]).reshape(-1)[0])

    # Hoisted per-gene text projection (independent of x), folded with the conv bias.
    gbias = te[gene_idx] @ w_t + b_c                                     # (G,)

    h_dim = int(np.asarray(params["w2"]).shape[0])
    out_dim = int(np.asarray(params["w3"]).shape[0])

    # Tiling / lane-dense padding.
    tk = min(_round_up(G, 128), tk_max)        # gene-tile size (multiple of 128)
    Gp = _round_up(G, tk)
    Hp = _round_up(max(h_dim, 128), 128)
    OUTp = _round_up(max(out_dim, 128), 128)

    def pad2(a, rows, cols):
        out = np.zeros((rows, cols), dtype=np.float32)
        out[:a.shape[0], :a.shape[1]] = a
        return out

    w1 = pad2(np.asarray(params["w1"], np.float32).T, Gp, FC1)           # (Gp, 512)
    b1 = np.asarray(params["b1"], np.float32).reshape(1, FC1)
    w2 = pad2(np.asarray(params["w2"], np.float32).T, FC1, Hp)           # (512, Hp)
    b2 = pad2(np.asarray(params["b2"], np.float32).reshape(1, -1), 1, Hp)
    w3 = pad2(np.asarray(params["w3"], np.float32).T, Hp, OUTp)          # (Hp, OUTp)
    b3 = pad2(np.asarray(params["b3"], np.float32).reshape(1, -1), 1, OUTp)

    return dict(
        wx=jnp.asarray([[w_x]], jnp.float32),                            # (1, 1) SMEM
        gbias=jnp.asarray(pad2(gbias.reshape(1, -1), 1, Gp)),            # (1, Gp) f32
        w1=jnp.asarray(w1, weight_dtype), b1=jnp.asarray(b1),
        w2=jnp.asarray(w2, weight_dtype), b2=jnp.asarray(b2),
        w3=jnp.asarray(w3, weight_dtype), b3=jnp.asarray(b3),
        gene_idx=jnp.asarray(gene_idx, jnp.int32),
        gather_needed=gather_needed,
        G=G, Gp=Gp, tk=tk, Hp=Hp, OUTp=OUTp, out_dim=out_dim,
    )


def _identity_concat_call(x_pad, prep):
    Bp, Gp = x_pad.shape
    tk, Hp, OUTp = prep["tk"], prep["Hp"], prep["OUTp"]
    nk = Gp // tk
    wbytes = prep["w1"].dtype.itemsize

    # Rough VMEM budget: double-buffered per-tile inputs + resident weights + scratch.
    dbl = 2 * (Bp * tk * 4 + tk * 4 + tk * FC1 * wbytes)
    res = (FC1 * 4 + FC1 * Hp * wbytes + Hp * 4 + Hp * OUTp * wbytes
           + OUTp * 4 + Bp * OUTp * 4 + Bp * FC1 * 4)
    vmem_limit = int(min(max(2 * (dbl + res), 32 * 1024 * 1024), 64 * 1024 * 1024))

    grid_spec = pltpu.PrefetchScalarGridSpec(
        num_scalar_prefetch=0,
        grid=(nk,),
        in_specs=[
            pl.BlockSpec((1, 1), lambda k: (0, 0),
                         memory_space=pltpu.MemorySpace.SMEM),           # wx (scalar)
            pl.BlockSpec((Bp, tk), lambda k: (0, k)),                    # x gene tile
            pl.BlockSpec((1, tk), lambda k: (0, k)),                     # gbias tile
            pl.BlockSpec((tk, FC1), lambda k: (k, 0)),                   # w1 gene tile
            pl.BlockSpec((1, FC1), lambda k: (0, 0)),                    # b1 (resident)
            pl.BlockSpec((FC1, Hp), lambda k: (0, 0)),                   # w2 (resident)
            pl.BlockSpec((1, Hp), lambda k: (0, 0)),                     # b2 (resident)
            pl.BlockSpec((Hp, OUTp), lambda k: (0, 0)),                  # w3 (resident)
            pl.BlockSpec((1, OUTp), lambda k: (0, 0)),                   # b3 (resident)
        ],
        out_specs=pl.BlockSpec((Bp, OUTp), lambda k: (0, 0)),
        scratch_shapes=[pltpu.VMEM((Bp, FC1), jnp.float32)],
    )

    return pl.pallas_call(
        identity_concat_kernel,
        out_shape=jax.ShapeDtypeStruct((Bp, OUTp), jnp.float32),
        grid_spec=grid_spec,
        compiler_params=pltpu.CompilerParams(
            dimension_semantics=("arbitrary",),        # gene axis is a reduction
            vmem_limit_bytes=vmem_limit),
    )(prep["wx"], x_pad, prep["gbias"], prep["w1"], prep["b1"],
      prep["w2"], prep["b2"], prep["w3"], prep["b3"])


def make_identity_concat_forward(text_embedding, params, *,
                                 weight_dtype=jnp.float32, tk_max=2048):
    """Returns a jitted forward(x) closure; all host prep happens here, once."""
    prep = prepare_identity_concat(text_embedding, params,
                                   weight_dtype=weight_dtype, tk_max=tk_max)

    @jax.jit
    def forward(x):
        x = x.astype(jnp.float32)
        if prep["gather_needed"]:
            x = jnp.take(x, prep["gene_idx"], axis=1)
        B, G = x.shape
        Bp = _round_up(max(B, 8), 8)
        x_pad = jnp.pad(x, ((0, Bp - B), (0, prep["Gp"] - G)))
        out = _identity_concat_call(x_pad, prep)
        return out[:B, :prep["out_dim"]]

    return forward


def reference_forward(x, te, params):
    """Pure-JAX reference mirroring the PyTorch forward (dropout p=0, mask keeps all)."""
    conv_w = params["conv_w"].reshape(-1)
    w_x, w_t = conv_w[0], conv_w[1:]
    c = te @ w_t
    h = jnp.maximum(w_x * x + c[None, :] + params["conv_b"].reshape(-1)[0], 0.0)
    y1 = jnp.maximum(h @ params["w1"].T + params["b1"], 0.0)
    y2 = jnp.maximum(y1 @ params["w2"].T + params["b2"], 0.0)
    return y2 @ params["w3"].T + params["b3"]


if __name__ == "__main__":
    # Small, consistent shapes: batch=8, gene_num=256, text_dim=128, h_dim=32, out_dim=16.
    B, G, T = 8, 256, 128
    H_DIM, OUT_DIM = 32, 16

    key = jax.random.PRNGKey(0)
    ks = jax.random.split(key, 10)

    x = jax.random.normal(ks[0], (B, G), jnp.float32)
    # +0.1 offset ensures every gene row sums to nonzero, so the mask keeps all genes
    # (required for the original module's fc1 to be shape-consistent).
    text_embedding = jax.random.normal(ks[1], (G, T), jnp.float32) + 0.1

    params = {
        "conv_w": jax.random.normal(ks[2], (1, 1, 1, T + 1), jnp.float32) * 0.05,
        "conv_b": jax.random.normal(ks[3], (1,), jnp.float32) * 0.05,
        "w1": jax.random.normal(ks[4], (FC1, G), jnp.float32) * 0.05,      # torch (out, in)
        "b1": jax.random.normal(ks[5], (FC1,), jnp.float32) * 0.05,
        "w2": jax.random.normal(ks[6], (H_DIM, FC1), jnp.float32) * 0.05,
        "b2": jax.random.normal(ks[7], (H_DIM,), jnp.float32) * 0.05,
        "w3": jax.random.normal(ks[8], (OUT_DIM, H_DIM), jnp.float32) * 0.05,
        "b3": jax.random.normal(ks[9], (OUT_DIM,), jnp.float32) * 0.05,
    }

    ref = reference_forward(x, text_embedding, params)

    # f32 path (default): exact to tight tolerance.
    fwd = make_identity_concat_forward(text_embedding, params)
    out = jax.block_until_ready(fwd(x))
    np.testing.assert_allclose(np.asarray(out), np.asarray(ref), rtol=1e-4, atol=1e-4)

    # bf16-weight path (recommended on v6e/v7x: halves w1 DMA bytes / VMEM, f32 accum).
    fwd_bf16 = make_identity_concat_forward(text_embedding, params,
                                            weight_dtype=jnp.bfloat16)
    out_bf16 = jax.block_until_ready(fwd_bf16(x))
    np.testing.assert_allclose(np.asarray(out_bf16), np.asarray(ref),
                               rtol=3e-2, atol=3e-2)

    print("KERNEL_OK")
</pallas_src>

<mosaic_0001>
module attributes {stable_mosaic.version = 11 : i64} {
  func.func @identity_concat_kernel(%arg0: i32, %arg1: memref<1x1xf32, #tpu.memory_space<smem>>, %arg2: memref<8x256xf32, #tpu.memory_space<vmem>>, %arg3: memref<1x256xf32, #tpu.memory_space<vmem>>, %arg4: memref<256x512xf32, #tpu.memory_space<vmem>>, %arg5: memref<1x512xf32, #tpu.memory_space<vmem>>, %arg6: memref<512x128xf32, #tpu.memory_space<vmem>>, %arg7: memref<1x128xf32, #tpu.memory_space<vmem>>, %arg8: memref<128x128xf32, #tpu.memory_space<vmem>>, %arg9: memref<1x128xf32, #tpu.memory_space<vmem>>, %arg10: memref<8x128xf32, #tpu.memory_space<vmem>>, %arg11: memref<8x512xf32, #tpu.memory_space<vmem>>) attributes {dimension_semantics = [#tpu.dimension_semantics<arbitrary>], iteration_bounds = array<i64: 1>, scalar_prefetch = 0 : i64, scratch_operands = 1 : i64, tpu.core_type = #tpu.core_type<tc>, window_params = [{transform_indices = @transform_0, window_bounds = array<i64: 1, 1>}, {transform_indices = @transform_1, window_bounds = array<i64: 8, 256>}, {transform_indices = @transform_2, window_bounds = array<i64: 1, 256>}, {transform_indices = @transform_3, window_bounds = array<i64: 256, 512>}, {pipeline_mode = #tpu.pipeline_mode<synchronous>, transform_indices = @transform_4, window_bounds = array<i64: 1, 512>}, {pipeline_mode = #tpu.pipeline_mode<synchronous>, transform_indices = @transform_5, window_bounds = array<i64: 512, 128>}, {pipeline_mode = #tpu.pipeline_mode<synchronous>, transform_indices = @transform_6, window_bounds = array<i64: 1, 128>}, {pipeline_mode = #tpu.pipeline_mode<synchronous>, transform_indices = @transform_7, window_bounds = array<i64: 128, 128>}, {pipeline_mode = #tpu.pipeline_mode<synchronous>, transform_indices = @transform_8, window_bounds = array<i64: 1, 128>}, {pipeline_mode = #tpu.pipeline_mode<synchronous>, transform_indices = @transform_9, window_bounds = array<i64: 8, 128>}]} {
    %c0_i32 = arith.constant 0 : i32
    %0 = arith.cmpi eq, %arg0, %c0_i32 : i32
    %1 = arith.extui %0 : i1 to i32
    %c0_i32_0 = arith.constant 0 : i32
    %2 = arith.cmpi ne, %1, %c0_i32_0 : i32
    scf.if %2 {
      %cst_15 = arith.constant 0.000000e+00 : f32
      %20 = vector.broadcast %cst_15 : f32 to vector<8x512xf32>
      %c0_16 = arith.constant 0 : index
      %c0_17 = arith.constant 0 : index
      %21 = vector.load %arg11[%c0_16, %c0_17] : memref<8x512xf32, #tpu.memory_space<vmem>>, vector<8x512xf32>
      tpu.vector_store %arg11[%c0_16, %c0_17], %20 {strides = array<i32>} : memref<8x512xf32, #tpu.memory_space<vmem>>, vector<8x512xf32>,
    } else {
    }
    %c0 = arith.constant 0 : index
    %c0_1 = arith.constant 0 : index
    %3 = memref.load %arg1[%c0, %c0_1] : memref<1x1xf32, #tpu.memory_space<smem>>
    %c0_2 = arith.constant 0 : index
    %c0_3 = arith.constant 0 : index
    %4 = vector.load %arg2[%c0_2, %c0_3] : memref<8x256xf32, #tpu.memory_space<vmem>>, vector<8x256xf32>
    %5 = vector.broadcast %3 : f32 to vector<8x256xf32>
    %6 = arith.mulf %5, %4 : vector<8x256xf32>
    %c0_4 = arith.constant 0 : index
    %c0_5 = arith.constant 0 : index
    %7 = vector.load %arg3[%c0_4, %c0_5] : memref<1x256xf32, #tpu.memory_space<vmem>>, vector<1x256xf32>
    %8 = vector.broadcast %7 : vector<1x256xf32> to vector<8x256xf32>
    %9 = arith.addf %6, %8 : vector<8x256xf32>
    %cst = arith.constant 0.000000e+00 : f32
    %10 = vector.broadcast %cst : f32 to vector<8x256xf32>
    %11 = arith.maximumf %9, %10 : vector<8x256xf32>
    %c0_6 = arith.constant 0 : index
    %c0_7 = arith.constant 0 : index
    %12 = vector.load %arg11[%c0_6, %c0_7] : memref<8x512xf32, #tpu.memory_space<vmem>>, vector<8x512xf32>
    %c0_8 = arith.constant 0 : index
    %c0_9 = arith.constant 0 : index
    %13 = vector.load %arg4[%c0_8, %c0_9] : memref<256x512xf32, #tpu.memory_space<vmem>>, vector<256x512xf32>
    %cst_10 = arith.constant dense<0.000000e+00> : vector<8x512xf32>
    %14 = tpu.matmul %11, %13, %cst_10 {dimension_numbers = #tpu.dot_dimension_numbers<[1], [0], [0], [1], [0, 0, 1, 1], [], []>} : vector<8x256xf32>, vector<256x512xf32>, vector<8x512xf32> -> vector<8x512xf32>
    %15 = arith.addf %12, %14 : vector<8x512xf32>
    %c0_11 = arith.constant 0 : index
    %c0_12 = arith.constant 0 : index
    %16 = vector.load %arg11[%c0_11, %c0_12] : memref<8x512xf32, #tpu.memory_space<vmem>>, vector<8x512xf32>
    tpu.vector_store %arg11[%c0_11, %c0_12], %15 {strides = array<i32>} : memref<8x512xf32, #tpu.memory_space<vmem>>, vector<8x512xf32>,
    %c0_i32_13 = arith.constant 0 : i32
    %17 = arith.cmpi eq, %arg0, %c0_i32_13 : i32
    %18 = arith.extui %17 : i1 to i32
    %c0_i32_14 = arith.constant 0 : i32
    %19 = arith.cmpi ne, %18, %c0_i32_14 : i32
    scf.if %19 {
      %c0_15 = arith.constant 0 : index
      %c0_16 = arith.constant 0 : index
      %20 = vector.load %arg11[%c0_15, %c0_16] : memref<8x512xf32, #tpu.memory_space<vmem>>, vector<8x512xf32>
      %c0_17 = arith.constant 0 : index
      %c0_18 = arith.constant 0 : index
      %21 = vector.load %arg5[%c0_17, %c0_18] : memref<1x512xf32, #tpu.memory_space<vmem>>, vector<1x512xf32>
      %22 = vector.broadcast %21 : vector<1x512xf32> to vector<8x512xf32>
      %23 = arith.addf %20, %22 : vector<8x512xf32>
      %cst_19 = arith.constant 0.000000e+00 : f32
      %24 = vector.broadcast %cst_19 : f32 to vector<8x512xf32>
      %25 = arith.maximumf %23, %24 : vector<8x512xf32>
      %c0_20 = arith.constant 0 : index
      %c0_21 = arith.constant 0 : index
      %26 = vector.load %arg6[%c0_20, %c0_21] : memref<512x128xf32, #tpu.memory_space<vmem>>, vector<512x128xf32>
      %cst_22 = arith.constant dense<0.000000e+00> : vector<8x128xf32>
      %27 = tpu.matmul %25, %26, %cst_22 {dimension_numbers = #tpu.dot_dimension_numbers<[1], [0], [0], [1], [0, 0, 1, 1], [], []>} : vector<8x512xf32>, vector<512x128xf32>, vector<8x128xf32> -> vector<8x128xf32>
      %c0_23 = arith.constant 0 : index
      %c0_24 = arith.constant 0 : index
      %28 = vector.load %arg7[%c0_23, %c0_24] : memref<1x128xf32, #tpu.memory_space<vmem>>, vector<1x128xf32>
      %29 = vector.broadcast %28 : vector<1x128xf32> to vector<8x128xf32>
      %30 = arith.addf %27, %29 : vector<8x128xf32>
      %cst_25 = arith.constant 0.000000e+00 : f32
      %31 = vector.broadcast %cst_25 : f32 to vector<8x128xf32>
      %32 = arith.maximumf %30, %31 : vector<8x128xf32>
      %c0_26 = arith.constant 0 : index
      %c0_27 = arith.constant 0 : index
      %33 = vector.load %arg8[%c0_26, %c0_27] : memref<128x128xf32, #tpu.memory_space<vmem>>, vector<128x128xf32>
      %cst_28 = arith.constant dense<0.000000e+00> : vector<8x128xf32>
      %34 = tpu.matmul %32, %33, %cst_28 {dimension_numbers = #tpu.dot_dimension_numbers<[1], [0], [0], [1], [0, 0, 1, 1], [], []>} : vector<8x128xf32>, vector<128x128xf32>, vector<8x128xf32> -> vector<8x128xf32>
      %c0_29 = arith.constant 0 : index
      %c0_30 = arith.constant 0 : index
      %35 = vector.load %arg9[%c0_29, %c0_30] : memref<1x128xf32, #tpu.memory_space<vmem>>, vector<1x128xf32>
      %36 = vector.broadcast %35 : vector<1x128xf32> to vector<8x128xf32>
      %37 = arith.addf %34, %36 : vector<8x128xf32>
      %c0_31 = arith.constant 0 : index
      %c0_32 = arith.constant 0 : index
      %38 = vector.load %arg10[%c0_31, %c0_32] : memref<8x128xf32, #tpu.memory_space<vmem>>, vector<8x128xf32>
      tpu.vector_store %arg10[%c0_31, %c0_32], %37 {strides = array<i32>} : memref<8x128xf32, #tpu.memory_space<vmem>>, vector<8x128xf32>,
    } else {
    }
    return
  }
  func.func @transform_0(%arg0: i32) -> (i32, i32) {
    %c0_i32 = arith.constant 0 : i32
    %c0_i32_0 = arith.constant 0 : i32
    %c0_i32_1 = arith.constant 0 : i32
    return %c0_i32, %c0_i32_0 : i32, i32
  }
  func.func @transform_1(%arg0: i32) -> (i32, i32) {
    %c0_i32 = arith.constant 0 : i32
    %c0_i32_0 = arith.constant 0 : i32
    return %c0_i32, %arg0 : i32, i32
  }
  func.func @transform_2(%arg0: i32) -> (i32, i32) {
    %c0_i32 = arith.constant 0 : i32
    %c0_i32_0 = arith.constant 0 : i32
    return %c0_i32, %arg0 : i32, i32
  }
  func.func @transform_3(%arg0: i32) -> (i32, i32) {
    %c0_i32 = arith.constant 0 : i32
    %c0_i32_0 = arith.constant 0 : i32
    return %arg0, %c0_i32 : i32, i32
  }
  func.func @transform_4(%arg0: i32) -> (i32, i32) {
    %c0_i32 = arith.constant 0 : i32
    %c0_i32_0 = arith.constant 0 : i32
    %c0_i32_1 = arith.constant 0 : i32
    return %c0_i32, %c0_i32_0 : i32, i32
  }
  func.func @transform_5(%arg0: i32) -> (i32, i32) {
    %c0_i32 = arith.constant 0 : i32
    %c0_i32_0 = arith.constant 0 : i32
    %c0_i32_1 = arith.constant 0 : i32
    return %c0_i32, %c0_i32_0 : i32, i32
  }
  func.func @transform_6(%arg0: i32) -> (i32, i32) {
    %c0_i32 = arith.constant 0 : i32
    %c0_i32_0 = arith.constant 0 : i32
    %c0_i32_1 = arith.constant 0 : i32
    return %c0_i32, %c0_i32_0 : i32, i32
  }
  func.func @transform_7(%arg0: i32) -> (i32, i32) {
    %c0_i32 = arith.constant 0 : i32
    %c0_i32_0 = arith.constant 0 : i32
    %c0_i32_1 = arith.constant 0 : i32
    return %c0_i32, %c0_i32_0 : i32, i32
  }
  func.func @transform_8(%arg0: i32) -> (i32, i32) {
    %c0_i32 = arith.constant 0 : i32
    %c0_i32_0 = arith.constant 0 : i32
    %c0_i32_1 = arith.constant 0 : i32
    return %c0_i32, %c0_i32_0 : i32, i32
  }
  func.func @transform_9(%arg0: i32) -> (i32, i32) {
    %c0_i32 = arith.constant 0 : i32
    %c0_i32_0 = arith.constant 0 : i32
    %c0_i32_1 = arith.constant 0 : i32
    return %c0_i32, %c0_i32_0 : i32, i32
  }
}

</mosaic_0001>

<bundles_post_ra>
// kernel: forward.1
= control target key start
LH: loop header
LB: loop body
LE: loop exit
PB: predicated region body
PF: predicated region fallthrough
CT: control target
= control target key end

     0   :  { %15 = vsyncpa [#allocation5], 0  ;;  %s963_s0 = inlined_call_operand.<no memory space> [shape: f32[1,1], index: 0, kind: input, shape index: {}]   ;;  %s964_s1 = inlined_call_operand.hbm [shape: f32[8,256], index: 1, kind: input, shape index: {}]   ;;  %s965_s2 = inlined_call_operand.hbm [shape: f32[1,256], index: 2, kind: input, shape index: {}]   ;;  %s966_s3 = inlined_call_operand.hbm [shape: f32[256,512], index: 3, kind: input, shape index: {}]   ;;  %s967_s4 = inlined_call_operand.hbm [shape: f32[1,512], index: 4, kind: input, shape index: {}]   ;;  %s968_s5 = inlined_call_operand.hbm [shape: f32[512,128], index: 5, kind: input, shape index: {}]   ;;  %s969_s6 = inlined_call_operand.vmem [shape: f32[1,128], index: 6, kind: input, shape index: {}]   ;;  %s970_s7 = inlined_call_operand.hbm [shape: f32[128,128], index: 7, kind: input, shape index: {}]   ;;  %s971_s8 = inlined_call_operand.vmem [shape: f32[1,128], index: 8, kind: input, shape index: {}]   ;;  %s972_s9 = inlined_call_operand.hbm [shape: f32[8,128], index: 9, kind: output, shape index: {}]  }
   0x1   :  { %16 = vsyncpa [#allocation8], 0 }
   0x2   :  { %17 = vsyncpa [#allocation11], 0 }
   0x3   :  { %18 = vsyncpa [#allocation14], 0  ;;  %s38_s11 = sshll.u32 %s965_s2, 4  ;;  %s39_s11 = int_to_ptr.hbm [resolvable:$true] %s38_s11 }
   0x4   :  { %19 = vsyncpa [#allocation6], 0  ;;  %s872_s12 = smov [#allocation7]   ;;  %s62_s16 = sshll.u32 %s967_s4, 4  ;;  %s63_s16 = int_to_ptr.hbm [resolvable:$true] %s62_s16 }
   0x5   :  { %s40_s13 = sshll.u32 %s872_s12, 4  ;;  %s873_s17 = smov [#allocation10]   ;;  %s41_s13 = int_to_ptr.vmem [resolvable:$true] %s40_s13 }
   0x6   :  { %43 = dma.hbm_to_vmem [thread:$0]  %s39_s11, 32, %s41_s13, [#allocation8]  }
   0x7   :  { %s64_s18 = sshll.u32 %s873_s17, 4  ;;  %s27_s21 = sshll.u32 %s964_s1, 4  ;;  %s65_s18 = int_to_ptr.vmem [resolvable:$true] %s64_s18  ;;  %s28_s21 = int_to_ptr.hbm [resolvable:$true] %s27_s21 }
   0x8   :  { %67 = dma.hbm_to_vmem [thread:$0]  %s63_s16, 64, %s65_s18, [#allocation11]  }
   0x9   :  { %s48_s23 = sshll.u32 %s966_s3, 4  ;;  %s874_s24 = smov [#allocation4]   ;;  %s49_s23 = int_to_ptr.hbm [resolvable:$true] %s48_s23 }
   0xa   :  { %s29_s25 = sshll.u32 %s874_s24, 4  ;;  %s875_s4 = smov [#allocation9]   ;;  %s30_s25 = int_to_ptr.vmem [resolvable:$true] %s29_s25 }
   0xb   :  { %32 = dma.hbm_to_vmem [thread:$0]  %s28_s21, 256, %s30_s25, [#allocation5]  }
   0xc   :  { %s50_s26 = sshll.u32 %s875_s4, 4  ;;  %s876_s27 = smov 512   ;;  %s51_s26 = int_to_ptr.vmem [resolvable:$true] %s50_s26 }
   0xd   :  { %s877_s28 = smov 32   ;;  %s72_s30 = sshll.u32 %s968_s5, 4  ;;  %s73_s30 = int_to_ptr.hbm [resolvable:$true] %s72_s30 }
   0xe   :  { %56 = dma.hbm_to_vmem [thread:$0]  %s49_s23, 16384, %s51_s26, [#allocation8], %s876_s27, %s876_s27, %s877_s28  }
   0xf   :  { %s878_s10 = smov [#allocation12]   ;;  %s87_s13 = sshll.u32 %s970_s7, 4  ;;  %s88_s13 = int_to_ptr.hbm [resolvable:$true] %s87_s13 }
  0x10   :  { %s74_s11 = sshll.u32 %s878_s10, 4  ;;  %s879_s14 = smov 128   ;;  %s75_s11 = int_to_ptr.vmem [resolvable:$true] %s74_s11 }
  0x11   :  { %s880_s15 = smov 8   ;;  %s881_s16 = smov [#allocation13]  }
  0x12   :  { %80 = dma.hbm_to_vmem [thread:$0]  %s73_s30, 8192, %s75_s11, [#allocation11], %s879_s14, %s879_s14, %s880_s15  }
  0x13   :  { %s89_s17 = sshll.u32 %s881_s16, 4  ;;  %s90_s17 = int_to_ptr.vmem [resolvable:$true] %s89_s17 }
  0x14   :  { %95 = dma.hbm_to_vmem [thread:$0]  %s88_s13, 2048, %s90_s17, [#allocation14], %s879_s14, %s879_s14, %s880_s15  }
  0x15   :  { %862 = dma.done.wait [#allocation5], 256  }
  0x16   :  { %863 = vsyncadd [#allocation5], 4294967040 }
  0x17   :  { %864 = dma.done.wait [#allocation8], 16416  }
  0x18   :  { %865 = vsyncadd [#allocation8], 4294950880 }
  0x19   :  { %866 = dma.done.wait [#allocation11], 8256  }
  0x1a   :  { %867 = vsyncadd [#allocation11], 4294959040 }
  0x1b   :  { %868 = dma.done.wait [#allocation14], 2048  }
  0x1c   :  { %869 = vsyncadd [#allocation14], 4294965248  ;;  %v210_v0 = vld [vmem:[#allocation9 + $0x1e0] sm:$0xff]  ;;  %v211_v2 = vld [vmem:[#allocation9 + $0x1e8] sm:$0xff]  ;;  %s882_s21 = smov [#allocation15]  }
  0x1d   :  { %v274_v1 = vld [vmem:[#allocation9 + $0x3e0] sm:$0xff]  ;;  %278 = vmatpush.msra.mxu0 %v210_v0  ;;  %v275_v3 = vld [vmem:[#allocation9 + $0x3e8] sm:$0xff]  ;;  %318 = vmatpush.msra.mxu2 %v211_v2  ;;  %v212_v0 = vld [vmem:[#allocation9 + $0x1f0] sm:$0xff]  ;;  %s666_s2 = sshll.u32 %s882_s21, 4  ;;  %s667_s2 = int_to_ptr.vmem [resolvable:$true] %s666_s2 }
  0x1e   :  { %298 = vmatpush.msra.mxu1 %v274_v1  ;;  %v206_v4 = vld [vmem:[#allocation9 + $0x1c0] sm:$0xff]  ;;  %338 = vmatpush.msra.mxu3 %v275_v3  ;;  %v207_v6 = vld [vmem:[#allocation9 + $0x1c8] sm:$0xff]  ;;  %v276_v1 = vld [vmem:[#allocation9 + $0x3f0] sm:$0xff] }
  0x1f   :  { %v270_v5 = vld [vmem:[#allocation9 + $0x3c0] sm:$0xff]  ;;  %v271_v7 = vld [vmem:[#allocation9 + $0x3c8] sm:$0xff]  ;;  %279 = vmatpush.msra.mxu0 %v206_v4  ;;  %319 = vmatpush.msra.mxu2 %v207_v6  ;;  %v213_v2 = vld [vmem:[#allocation9 + $0x1f8] sm:$0xff] }
  0x20   :  { %v202_v8 = vld [vmem:[#allocation9 + $0x1a0] sm:$0xff]  ;;  %299 = vmatpush.msra.mxu1 %v270_v5  ;;  %v203_v10 = vld [vmem:[#allocation9 + $0x1a8] sm:$0xff]  ;;  %339 = vmatpush.msra.mxu3 %v271_v7  ;;  %v277_v3 = vld [vmem:[#allocation9 + $0x3f8] sm:$0xff] }
  0x21   :  { %v266_v9 = vld [vmem:[#allocation9 + $0x3a0] sm:$0xff]  ;;  %v267_v11 = vld [vmem:[#allocation9 + $0x3a8] sm:$0xff]  ;;  %280 = vmatpush.msra.mxu0 %v202_v8  ;;  %320 = vmatpush.msra.mxu2 %v203_v10  ;;  %v208_v4 = vld [vmem:[#allocation9 + $0x1d0] sm:$0xff] }
  0x22   :  { %v198_v12 = vld [vmem:[#allocation9 + $0x180] sm:$0xff]  ;;  %300 = vmatpush.msra.mxu1 %v266_v9  ;;  %v199_v14 = vld [vmem:[#allocation9 + $0x188] sm:$0xff]  ;;  %340 = vmatpush.msra.mxu3 %v267_v11  ;;  %v272_v5 = vld [vmem:[#allocation9 + $0x3d0] sm:$0xff] }
  0x23   :  { %v262_v13 = vld [vmem:[#allocation9 + $0x380] sm:$0xff]  ;;  %v263_v15 = vld [vmem:[#allocation9 + $0x388] sm:$0xff]  ;;  %281 = vmatpush.msra.mxu0 %v198_v12  ;;  %321 = vmatpush.msra.mxu2 %v199_v14  ;;  %v209_v6 = vld [vmem:[#allocation9 + $0x1d8] sm:$0xff] }
  0x24   :  { %v194_v16 = vld [vmem:[#allocation9 + $0x160] sm:$0xff]  ;;  %301 = vmatpush.msra.mxu1 %v262_v13  ;;  %v195_v18 = vld [vmem:[#allocation9 + $0x168] sm:$0xff]  ;;  %341 = vmatpush.msra.mxu3 %v263_v15  ;;  %v273_v7 = vld [vmem:[#allocation9 + $0x3d8] sm:$0xff] }
  0x25   :  { %v258_v17 = vld [vmem:[#allocation9 + $0x360] sm:$0xff]  ;;  %v259_v19 = vld [vmem:[#allocation9 + $0x368] sm:$0xff]  ;;  %282 = vmatpush.msra.mxu0 %v194_v16  ;;  %322 = vmatpush.msra.mxu2 %v195_v18  ;;  %v204_v8 = vld [vmem:[#allocation9 + $0x1b0] sm:$0xff] }
  0x26   :  { %v190_v20 = vld [vmem:[#allocation9 + $0x140] sm:$0xff]  ;;  %302 = vmatpush.msra.mxu1 %v258_v17  ;;  %v191_v22 = vld [vmem:[#allocation9 + $0x148] sm:$0xff]  ;;  %342 = vmatpush.msra.mxu3 %v259_v19  ;;  %v268_v9 = vld [vmem:[#allocation9 + $0x3b0] sm:$0xff] }
  0x27   :  { %v254_v21 = vld [vmem:[#allocation9 + $0x340] sm:$0xff]  ;;  %v255_v23 = vld [vmem:[#allocation9 + $0x348] sm:$0xff]  ;;  %283 = vmatpush.msra.mxu0 %v190_v20  ;;  %323 = vmatpush.msra.mxu2 %v191_v22  ;;  %v205_v10 = vld [vmem:[#allocation9 + $0x1b8] sm:$0xff] }
  0x28   :  { %v186_v24 = vld [vmem:[#allocation9 + $0x120] sm:$0xff]  ;;  %303 = vmatpush.msra.mxu1 %v254_v21  ;;  %v187_v26 = vld [vmem:[#allocation9 + $0x128] sm:$0xff]  ;;  %343 = vmatpush.msra.mxu3 %v255_v23  ;;  %v269_v11 = vld [vmem:[#allocation9 + $0x3b8] sm:$0xff] }
  0x29   :  { %v250_v25 = vld [vmem:[#allocation9 + $0x320] sm:$0xff]  ;;  %v251_v27 = vld [vmem:[#allocation9 + $0x328] sm:$0xff]  ;;  %284 = vmatpush.msra.mxu0 %v186_v24  ;;  %324 = vmatpush.msra.mxu2 %v187_v26  ;;  %v200_v12 = vld [vmem:[#allocation9 + $0x190] sm:$0xff] }
  0x2a   :  { %v182_v28 = vld [vmem:[#allocation9 + $0x100] sm:$0xff]  ;;  %304 = vmatpush.msra.mxu1 %v250_v25  ;;  %v183_v30 = vld [vmem:[#allocation9 + $0x108] sm:$0xff]  ;;  %344 = vmatpush.msra.mxu3 %v251_v27  ;;  %v264_v13 = vld [vmem:[#allocation9 + $0x390] sm:$0xff]  ;;  %v133_v27 = vstv %s963_s0 }
  0x2b   :  { %v246_v29 = vld [vmem:[#allocation9 + $0x300] sm:$0xff]  ;;  %v247_v31 = vld [vmem:[#allocation9 + $0x308] sm:$0xff]  ;;  %285 = vmatpush.msra.mxu0 %v182_v28  ;;  %325 = vmatpush.msra.mxu2 %v183_v30  ;;  %v201_v14 = vld [vmem:[#allocation9 + $0x198] sm:$0xff] }
  0x2c   :  { %v178_v32 = vld [vmem:[#allocation9 + $0xe0] sm:$0xff]  ;;  %305 = vmatpush.msra.mxu1 %v246_v29  ;;  %v179_v34 = vld [vmem:[#allocation9 + $0xe8] sm:$0xff]  ;;  %345 = vmatpush.msra.mxu3 %v247_v31  ;;  %v265_v15 = vld [vmem:[#allocation9 + $0x398] sm:$0xff] }
  0x2d   :  { %v242_v33 = vld [vmem:[#allocation9 + $0x2e0] sm:$0xff]  ;;  %v243_v35 = vld [vmem:[#allocation9 + $0x2e8] sm:$0xff]  ;;  %286 = vmatpush.msra.mxu0 %v178_v32  ;;  %326 = vmatpush.msra.mxu2 %v179_v34  ;;  %v196_v16 = vld [vmem:[#allocation9 + $0x170] sm:$0xff] }
  0x2e   :  { %v174_v36 = vld [vmem:[#allocation9 + $0xc0] sm:$0xff]  ;;  %306 = vmatpush.msra.mxu1 %v242_v33  ;;  %v175_v38 = vld [vmem:[#allocation9 + $0xc8] sm:$0xff]  ;;  %346 = vmatpush.msra.mxu3 %v243_v35  ;;  %v260_v17 = vld [vmem:[#allocation9 + $0x370] sm:$0xff] }
  0x2f   :  { %v238_v37 = vld [vmem:[#allocation9 + $0x2c0] sm:$0xff]  ;;  %v239_v39 = vld [vmem:[#allocation9 + $0x2c8] sm:$0xff]  ;;  %287 = vmatpush.msra.mxu0 %v174_v36  ;;  %327 = vmatpush.msra.mxu2 %v175_v38  ;;  %v197_v18 = vld [vmem:[#allocation9 + $0x178] sm:$0xff] }
  0x30   :  { %v170_v40 = vld [vmem:[#allocation9 + $0xa0] sm:$0xff]  ;;  %307 = vmatpush.msra.mxu1 %v238_v37  ;;  %v171_v42 = vld [vmem:[#allocation9 + $0xa8] sm:$0xff]  ;;  %347 = vmatpush.msra.mxu3 %v239_v39  ;;  %v261_v19 = vld [vmem:[#allocation9 + $0x378] sm:$0xff] }
  0x31   :  { %v234_v41 = vld [vmem:[#allocation9 + $0x2a0] sm:$0xff]  ;;  %v235_v43 = vld [vmem:[#allocation9 + $0x2a8] sm:$0xff]  ;;  %288 = vmatpush.msra.mxu0 %v170_v40  ;;  %328 = vmatpush.msra.mxu2 %v171_v42  ;;  %v192_v20 = vld [vmem:[#allocation9 + $0x150] sm:$0xff] }
  0x32   :  { %v166_v44 = vld [vmem:[#allocation9 + $0x80] sm:$0xff]  ;;  %308 = vmatpush.msra.mxu1 %v234_v41  ;;  %v167_v46 = vld [vmem:[#allocation9 + $0x88] sm:$0xff]  ;;  %348 = vmatpush.msra.mxu3 %v235_v43  ;;  %v256_v21 = vld [vmem:[#allocation9 + $0x350] sm:$0xff] }
  0x33   :  { %v230_v45 = vld [vmem:[#allocation9 + $0x280] sm:$0xff]  ;;  %v231_v47 = vld [vmem:[#allocation9 + $0x288] sm:$0xff]  ;;  %289 = vmatpush.msra.mxu0 %v166_v44  ;;  %329 = vmatpush.msra.mxu2 %v167_v46  ;;  %v193_v22 = vld [vmem:[#allocation9 + $0x158] sm:$0xff] }
  0x34   :  { %v162_v48 = vld [vmem:[#allocation9 + $0x60] sm:$0xff]  ;;  %309 = vmatpush.msra.mxu1 %v230_v45  ;;  %v163_v50 = vld [vmem:[#allocation9 + $0x68] sm:$0xff]  ;;  %349 = vmatpush.msra.mxu3 %v231_v47  ;;  %v257_v23 = vld [vmem:[#allocation9 + $0x358] sm:$0xff] }
  0x35   :  { %v226_v49 = vld [vmem:[#allocation9 + $0x260] sm:$0xff]  ;;  %v227_v51 = vld [vmem:[#allocation9 + $0x268] sm:$0xff]  ;;  %290 = vmatpush.msra.mxu0 %v162_v48  ;;  %330 = vmatpush.msra.mxu2 %v163_v50  ;;  %v188_v24 = vld [vmem:[#allocation9 + $0x130] sm:$0xff] }
  0x36   :  { %v158_v52 = vld [vmem:[#allocation9 + $0x40] sm:$0xff]  ;;  %310 = vmatpush.msra.mxu1 %v226_v49  ;;  %v159_v54 = vld [vmem:[#allocation9 + $0x48] sm:$0xff]  ;;  %350 = vmatpush.msra.mxu3 %v227_v51  ;;  %v252_v25 = vld [vmem:[#allocation9 + $0x330] sm:$0xff] }
  0x37   :  { %v222_v53 = vld [vmem:[#allocation9 + $0x240] sm:$0xff]  ;;  %v223_v55 = vld [vmem:[#allocation9 + $0x248] sm:$0xff]  ;;  %291 = vmatpush.msra.mxu0 %v158_v52  ;;  %331 = vmatpush.msra.mxu2 %v159_v54  ;;  %v136_v28 = vld [vmem:[#allocation7] sm:$0x3] }
  0x38   :  { %v154_v56 = vld [vmem:[#allocation9 + $0x20] sm:$0xff]  ;;  %311 = vmatpush.msra.mxu1 %v222_v53  ;;  %v155_v58 = vld [vmem:[#allocation9 + $0x28] sm:$0xff]  ;;  %351 = vmatpush.msra.mxu3 %v223_v55  ;;  %v132_v29 = vld [vmem:[#allocation4 + $0x8] sm:$0xff]  ;;  %v138_v37 = vperm.slane %v136_v28, 0  ;;  %v139_v39 = vperm.slane %v136_v28, 1 }
  0x39   :  { %v218_v57 = vld [vmem:[#allocation9 + $0x220] sm:$0xff]  ;;  %v219_v59 = vld [vmem:[#allocation9 + $0x228] sm:$0xff]  ;;  %292 = vmatpush.msra.mxu0 %v154_v56  ;;  %332 = vmatpush.msra.mxu2 %v155_v58  ;;  %v189_v30 = vld [vmem:[#allocation9 + $0x138] sm:$0xff]  ;;  %v135_v38 = vmul.f32 %v133_v27, %v132_v29 }
  0x3a   :  { %v150_v60 = vld [vmem:[#allocation9] sm:$0xff]  ;;  %312 = vmatpush.msra.mxu1 %v218_v57  ;;  %v151_v62 = vld [vmem:[#allocation9 + $0x8] sm:$0xff]  ;;  %352 = vmatpush.msra.mxu3 %v219_v59  ;;  %v253_v31 = vld [vmem:[#allocation9 + $0x338] sm:$0xff] }
  0x3b   :  { %v214_v61 = vld [vmem:[#allocation9 + $0x200] sm:$0xff]  ;;  %v215_v63 = vld [vmem:[#allocation9 + $0x208] sm:$0xff]  ;;  %293 = vmatpush.msra.mxu0 %v150_v60  ;;  %333 = vmatpush.msra.mxu2 %v151_v62  ;;  %v184_v32 = vld [vmem:[#allocation9 + $0x110] sm:$0xff]  ;;  %v143_v49 = vadd.f32 %v139_v39, %v135_v38 }
  0x3c   :  { %313 = vmatpush.msra.mxu1 %v214_v61  ;;  %353 = vmatpush.msra.mxu3 %v215_v63  ;;  %v131_v26 = vld [vmem:[#allocation4] sm:$0xff]  ;;  %v185_v34 = vld [vmem:[#allocation9 + $0x118] sm:$0xff]  ;;  %v479_v38 = vld [vmem:[#allocation12 + $0x40] sm:$0xff] }
  0x3d   :  { %358 = vmatpush.msrb.mxu0 %v212_v0  ;;  %398 = vmatpush.msrb.mxu2 %v213_v2  ;;  %v248_v33 = vld [vmem:[#allocation9 + $0x310] sm:$0xff]  ;;  %v249_v35 = vld [vmem:[#allocation9 + $0x318] sm:$0xff]  ;;  %v134_v36 = vmul.f32 %v133_v27, %v131_v26  ;;  %v145_v59 = vmax.f32 %v143_v49, 0.0  ;;  %v515_v26 = vld [vmem:[#allocation12 + $0x160] sm:$0xff] }
  0x3e   :  { %378 = vmatpush.msrb.mxu1 %v276_v1  ;;  %418 = vmatpush.msrb.mxu3 %v277_v3  ;;  %v180_v40 = vld [vmem:[#allocation9 + $0xf0] sm:$0xff]  ;;  %v181_v42 = vld [vmem:[#allocation9 + $0xf8] sm:$0xff]  ;;  %v531_v27 = vld [vmem:[#allocation12 + $0x1e0] sm:$0xff] }
  0x3f   :  { %359 = vmatpush.msrb.mxu0 %v208_v4  ;;  %399 = vmatpush.msrb.mxu2 %v209_v6  ;;  %v244_v41 = vld [vmem:[#allocation9 + $0x2f0] sm:$0xff]  ;;  %v245_v43 = vld [vmem:[#allocation9 + $0x2f8] sm:$0xff]  ;;  %v142_v48 = vadd.f32 %v138_v37, %v134_v36  ;;  %v495_v39 = vld [vmem:[#allocation12 + $0xc0] sm:$0xff] }
  0x40   :  { %379 = vmatpush.msrb.mxu1 %v272_v5  ;;  %419 = vmatpush.msrb.mxu3 %v273_v7  ;;  %v176_v44 = vld [vmem:[#allocation9 + $0xd0] sm:$0xff]  ;;  %v177_v46 = vld [vmem:[#allocation9 + $0xd8] sm:$0xff] }
  0x41   :  { %360 = vmatpush.msrb.mxu0 %v204_v8  ;;  %400 = vmatpush.msrb.mxu2 %v205_v10  ;;  %v240_v45 = vld [vmem:[#allocation9 + $0x2d0] sm:$0xff]  ;;  %v241_v47 = vld [vmem:[#allocation9 + $0x2d8] sm:$0xff]  ;;  %v144_v58 = vmax.f32 %v142_v48, 0.0  ;;  %v475_v48 = vld [vmem:[#allocation12 + $0x20] sm:$0xff] }
  0x42   :  { %380 = vmatpush.msrb.mxu1 %v268_v9  ;;  %420 = vmatpush.msrb.mxu3 %v269_v11  ;;  %v172_v50 = vld [vmem:[#allocation9 + $0xb0] sm:$0xff]  ;;  %v173_v52 = vld [vmem:[#allocation9 + $0xb8] sm:$0xff] }
  0x43   :  { %361 = vmatpush.msrb.mxu0 %v200_v12  ;;  %401 = vmatpush.msrb.mxu2 %v201_v14  ;;  %v236_v51 = vld [vmem:[#allocation9 + $0x2b0] sm:$0xff]  ;;  %v237_v53 = vld [vmem:[#allocation9 + $0x2b8] sm:$0xff] }
  0x44   :  { %381 = vmatpush.msrb.mxu1 %v264_v13  ;;  %421 = vmatpush.msrb.mxu3 %v265_v15  ;;  %v168_v54 = vld [vmem:[#allocation9 + $0x90] sm:$0xff]  ;;  %v169_v56 = vld [vmem:[#allocation9 + $0x98] sm:$0xff] }
  0x45   :  { %362 = vmatpush.msrb.mxu0 %v196_v16  ;;  %402 = vmatpush.msrb.mxu2 %v197_v18  ;;  %v232_v55 = vld [vmem:[#allocation9 + $0x290] sm:$0xff]  ;;  %v233_v57 = vld [vmem:[#allocation9 + $0x298] sm:$0xff] }
  0x46   :  { %382 = vmatpush.msrb.mxu1 %v260_v17  ;;  %422 = vmatpush.msrb.mxu3 %v261_v19  ;;  %v164_v60 = vld [vmem:[#allocation9 + $0x70] sm:$0xff]  ;;  %v165_v62 = vld [vmem:[#allocation9 + $0x78] sm:$0xff] }
  0x47   :  { %363 = vmatpush.msrb.mxu0 %v192_v20  ;;  %403 = vmatpush.msrb.mxu2 %v193_v22  ;;  %v228_v61 = vld [vmem:[#allocation9 + $0x270] sm:$0xff]  ;;  %v229_v63 = vld [vmem:[#allocation9 + $0x278] sm:$0xff] }
  0x48   :  { %383 = vmatpush.msrb.mxu1 %v256_v21  ;;  %423 = vmatpush.msrb.mxu3 %v257_v23  ;;  %v160_v0 = vld [vmem:[#allocation9 + $0x50] sm:$0xff]  ;;  %v161_v2 = vld [vmem:[#allocation9 + $0x58] sm:$0xff] }
  0x49   :  { %364 = vmatpush.msrb.mxu0 %v188_v24  ;;  %404 = vmatpush.msrb.mxu2 %v189_v30  ;;  %v224_v1 = vld [vmem:[#allocation9 + $0x250] sm:$0xff]  ;;  %v225_v3 = vld [vmem:[#allocation9 + $0x258] sm:$0xff]  ;;  %v483_v24 = vld [vmem:[#allocation12 + $0x60] sm:$0xff] }
  0x4a   :  { %384 = vmatpush.msrb.mxu1 %v252_v25  ;;  %424 = vmatpush.msrb.mxu3 %v253_v31  ;;  %v156_v4 = vld [vmem:[#allocation9 + $0x30] sm:$0xff]  ;;  %v157_v6 = vld [vmem:[#allocation9 + $0x38] sm:$0xff]  ;;  %v499_v25 = vld [vmem:[#allocation12 + $0xe0] sm:$0xff] }
  0x4b   :  { %365 = vmatpush.msrb.mxu0 %v184_v32  ;;  %405 = vmatpush.msrb.mxu2 %v185_v34  ;;  %v220_v5 = vld [vmem:[#allocation9 + $0x230] sm:$0xff]  ;;  %v221_v7 = vld [vmem:[#allocation9 + $0x238] sm:$0xff] }
  0x4c   :  { %385 = vmatpush.msrb.mxu1 %v248_v33  ;;  %425 = vmatpush.msrb.mxu3 %v249_v35  ;;  %v152_v8 = vld [vmem:[#allocation9 + $0x10] sm:$0xff]  ;;  %v153_v10 = vld [vmem:[#allocation9 + $0x18] sm:$0xff] }
  0x4d   :  { %366 = vmatpush.msrb.mxu0 %v180_v40  ;;  %406 = vmatpush.msrb.mxu2 %v181_v42  ;;  %v216_v9 = vld [vmem:[#allocation9 + $0x210] sm:$0xff]  ;;  %v217_v11 = vld [vmem:[#allocation9 + $0x218] sm:$0xff]  ;;  %v511_v40 = vld [vmem:[#allocation12 + $0x140] sm:$0xff] }
  0x4e   :  { %386 = vmatpush.msrb.mxu1 %v244_v41  ;;  %426 = vmatpush.msrb.mxu3 %v245_v43  ;;  %v486_v12 = vld [vmem:[#allocation12 + $0x78] sm:$0xff]  ;;  %v485_v16 = vld [vmem:[#allocation12 + $0x70] sm:$0xff]  ;;  %v484_v20 = vld [vmem:[#allocation12 + $0x68] sm:$0xff] }
  0x4f   :  { %367 = vmatpush.msrb.mxu0 %v176_v44  ;;  %407 = vmatpush.msrb.mxu2 %v177_v46  ;;  %v502_v13 = vld [vmem:[#allocation12 + $0xf8] sm:$0xff]  ;;  %v501_v17 = vld [vmem:[#allocation12 + $0xf0] sm:$0xff]  ;;  %v500_v21 = vld [vmem:[#allocation12 + $0xe8] sm:$0xff] }
  0x50   :  { %387 = vmatpush.msrb.mxu1 %v240_v45  ;;  %427 = vmatpush.msrb.mxu3 %v241_v47  ;;  %v518_v14 = vld [vmem:[#allocation12 + $0x178] sm:$0xff]  ;;  %v517_v18 = vld [vmem:[#allocation12 + $0x170] sm:$0xff]  ;;  %v516_v22 = vld [vmem:[#allocation12 + $0x168] sm:$0xff] }
  0x51   :  { %368 = vmatpush.msrb.mxu0 %v172_v50  ;;  %408 = vmatpush.msrb.mxu2 %v173_v52  ;;  %v534_v15 = vld [vmem:[#allocation12 + $0x1f8] sm:$0xff]  ;;  %v533_v19 = vld [vmem:[#allocation12 + $0x1f0] sm:$0xff]  ;;  %v532_v23 = vld [vmem:[#allocation12 + $0x1e8] sm:$0xff] }
  0x52   :  { %388 = vmatpush.msrb.mxu1 %v236_v51  ;;  %428 = vmatpush.msrb.mxu3 %v237_v53  ;;  %v482_v28 = vld [vmem:[#allocation12 + $0x58] sm:$0xff]  ;;  %v481_v32 = vld [vmem:[#allocation12 + $0x50] sm:$0xff]  ;;  %v480_v35 = vld [vmem:[#allocation12 + $0x48] sm:$0xff] }
  0x53   :  { %369 = vmatpush.msrb.mxu0 %v168_v54  ;;  %409 = vmatpush.msrb.mxu2 %v169_v56  ;;  %v498_v29 = vld [vmem:[#allocation12 + $0xd8] sm:$0xff]  ;;  %v497_v33 = vld [vmem:[#allocation12 + $0xd0] sm:$0xff]  ;;  %v496_v36 = vld [vmem:[#allocation12 + $0xc8] sm:$0xff] }
  0x54   :  { %389 = vmatpush.msrb.mxu1 %v232_v55  ;;  %429 = vmatpush.msrb.mxu3 %v233_v57  ;;  %v514_v30 = vld [vmem:[#allocation12 + $0x158] sm:$0xff]  ;;  %v513_v34 = vld [vmem:[#allocation12 + $0x150] sm:$0xff]  ;;  %v512_v37 = vld [vmem:[#allocation12 + $0x148] sm:$0xff] }
  0x55   :  { %294 = vmatmul.f32.vlgmr.msra.gmra.mxu0 %v144_v58  ;;  %314 = vmatmul.f32.vlgmr.msra.gmra.mxu1 %v145_v59  ;;  %v530_v31 = vld [vmem:[#allocation12 + $0x1d8] sm:$0xff]  ;;  %v477_v43 = vld [vmem:[#allocation12 + $0x30] sm:$0xff]  ;;  %v476_v44 = vld [vmem:[#allocation12 + $0x28] sm:$0xff] }
  0x56   :  { %334 = vmatmul.f32.vlgmr.msra.gmra.mxu2 %v144_v58  ;;  %354 = vmatmul.f32.vlgmr.msra.gmra.mxu3 %v145_v59  ;;  %v478_v41 = vld [vmem:[#allocation12 + $0x38] sm:$0xff]  ;;  %v493_v45 = vld [vmem:[#allocation12 + $0xb0] sm:$0xff]  ;;  %v492_v49 = vld [vmem:[#allocation12 + $0xa8] sm:$0xff] }
  0x57   :  { %370 = vmatpush.msrb.mxu0 %v164_v60  ;;  %390 = vmatpush.msrb.mxu1 %v228_v61  ;;  %v494_v42 = vld [vmem:[#allocation12 + $0xb8] sm:$0xff]  ;;  %v529_v47 = vld [vmem:[#allocation12 + $0x1d0] sm:$0xff]  ;;  %v528_v51 = vld [vmem:[#allocation12 + $0x1c8] sm:$0xff] }
  0x58   :  { %410 = vmatpush.msrb.mxu2 %v165_v62  ;;  %430 = vmatpush.msrb.mxu3 %v229_v63  ;;  %v510_v46 = vld [vmem:[#allocation12 + $0x138] sm:$0xff]  ;;  %v509_v50 = vld [vmem:[#allocation12 + $0x130] sm:$0xff]  ;;  %v491_v53 = vld [vmem:[#allocation12 + $0xa0] sm:$0xff] }
  0x59   :  { %371 = vmatpush.msrb.mxu0 %v160_v0  ;;  %391 = vmatpush.msrb.mxu1 %v224_v1  ;;  %v474_v52 = vld [vmem:[#allocation12 + $0x18] sm:$0xff]  ;;  %v508_v54 = vld [vmem:[#allocation12 + $0x128] sm:$0xff]  ;;  %v527_v55 = vld [vmem:[#allocation12 + $0x1c0] sm:$0xff] }
  0x5a   :  { %411 = vmatpush.msrb.mxu2 %v161_v2  ;;  %431 = vmatpush.msrb.mxu3 %v225_v3  ;;  %v473_v56 = vld [vmem:[#allocation12 + $0x10] sm:$0xff]  ;;  %v490_v57 = vld [vmem:[#allocation12 + $0x98] sm:$0xff]  ;;  %v472_v60 = vld [vmem:[#allocation12 + $0x8] sm:$0xff] }
  0x5b   :  { %372 = vmatpush.msrb.mxu0 %v156_v4  ;;  %392 = vmatpush.msrb.mxu1 %v220_v5  ;;  %v489_v61 = vld [vmem:[#allocation12 + $0x90] sm:$0xff]  ;;  %v506_v62 = vld [vmem:[#allocation12 + $0x118] sm:$0xff]  ;;  %v471_v0 = vld [vmem:[#allocation12] sm:$0xff] }
  0x5c   :  { %412 = vmatpush.msrb.mxu2 %v157_v6  ;;  %432 = vmatpush.msrb.mxu3 %v221_v7  ;;  %v525_v63 = vld [vmem:[#allocation12 + $0x1b0] sm:$0xff]  ;;  %v488_v1 = vld [vmem:[#allocation12 + $0x88] sm:$0xff]  ;;  %v487_v4 = vld [vmem:[#allocation12 + $0x80] sm:$0xff] }
  0x5d   :  { %373 = vmatpush.msrb.mxu0 %v152_v8  ;;  %393 = vmatpush.msrb.mxu1 %v216_v9  ;;  %v505_v2 = vld [vmem:[#allocation12 + $0x110] sm:$0xff]  ;;  %v524_v3 = vld [vmem:[#allocation12 + $0x1a8] sm:$0xff]  ;;  %v523_v6 = vld [vmem:[#allocation12 + $0x1a0] sm:$0xff] }
  0x5e   :  { %413 = vmatpush.msrb.mxu2 %v153_v10  ;;  %433 = vmatpush.msrb.mxu3 %v217_v11  ;;  %v504_v5 = vld [vmem:[#allocation12 + $0x108] sm:$0xff]  ;;  %v503_v7 = vld [vmem:[#allocation12 + $0x100] sm:$0xff]  ;;  %v522_v8 = vld [vmem:[#allocation12 + $0x198] sm:$0xff] }
  0x5f   :  { %374 = vmatmul.f32.vlgmr.msrb.gmra.mxu0 %v144_v58  ;;  %394 = vmatmul.f32.vlgmr.msrb.gmra.mxu1 %v145_v59  ;;  %v521_v9 = vld [vmem:[#allocation12 + $0x190] sm:$0xff]  ;;  %v520_v10 = vld [vmem:[#allocation12 + $0x188] sm:$0xff]  ;;  %v519_v11 = vld [vmem:[#allocation12 + $0x180] sm:$0xff] }
  0x60   :  { %414 = vmatmul.f32.vlgmr.msrb.gmra.mxu2 %v144_v58  ;;  %434 = vmatmul.f32.vlgmr.msrb.gmra.mxu3 %v145_v59  ;;  %v507_v58 = vld [vmem:[#allocation12 + $0x120] sm:$0xff]  ;;  %v526_v59 = vld [vmem:[#allocation12 + $0x1b8] sm:$0xff] }
  0x61   :  { %539 = vmatpush.msra.mxu0 %v486_v12  ;;  %559 = vmatpush.msra.mxu1 %v502_v13  ;;  %v635_v12 = vld [vmem:[#allocation13 + $0x78] sm:$0xff]  ;;  %v634_v13 = vld [vmem:[#allocation13 + $0x70] sm:$0xff] }
  0x62   :  { %579 = vmatpush.msra.mxu2 %v518_v14  ;;  %599 = vmatpush.msra.mxu3 %v534_v15  ;;  %v633_v14 = vld [vmem:[#allocation13 + $0x68] sm:$0xff]  ;;  %v453_v15 = vld [vmem:[#allocation10] sm:$0xf] }
  0x63   :  { %540 = vmatpush.msra.mxu0 %v485_v16  ;;  %560 = vmatpush.msra.mxu1 %v501_v17  ;;  %v632_v16 = vld [vmem:[#allocation13 + $0x60] sm:$0xff]  ;;  %v631_v17 = vld [vmem:[#allocation13 + $0x58] sm:$0xff] }
  0x64   :  { %580 = vmatpush.msra.mxu2 %v517_v18  ;;  %600 = vmatpush.msra.mxu3 %v533_v19  ;;  %v455_v18 = vperm.slane %v453_v15, 0 }
  0x65   :  { %541 = vmatpush.msra.mxu0 %v484_v20  ;;  %561 = vmatpush.msra.mxu1 %v500_v21 }
  0x66   :  { %581 = vmatpush.msra.mxu2 %v516_v22  ;;  %601 = vmatpush.msra.mxu3 %v532_v23 }
  0x67   :  { %542 = vmatpush.msra.mxu0 %v483_v24  ;;  %562 = vmatpush.msra.mxu1 %v499_v25  ;;  %v456_v24 = vperm.slane %v453_v15, 1 }
  0x68   :  { %582 = vmatpush.msra.mxu2 %v515_v26  ;;  %602 = vmatpush.msra.mxu3 %v531_v27 }
  0x69   :  { %543 = vmatpush.msra.mxu0 %v482_v28  ;;  %563 = vmatpush.msra.mxu1 %v498_v29  ;;  %v457_v28 = vperm.slane %v453_v15, 2 }
  0x6a   :  { %583 = vmatpush.msra.mxu2 %v514_v30  ;;  %603 = vmatpush.msra.mxu3 %v530_v31 }
  0x6b   :  { %544 = vmatpush.msra.mxu0 %v481_v32  ;;  %564 = vmatpush.msra.mxu1 %v497_v33 }
  0x6c   :  { %584 = vmatpush.msra.mxu2 %v513_v34  ;;  %604 = vmatpush.msra.mxu3 %v529_v47  ;;  %v625_v47 = vld [vmem:[#allocation13 + $0x28] sm:$0xff] }
  0x6d   :  { %545 = vmatpush.msra.mxu0 %v480_v35  ;;  %565 = vmatpush.msra.mxu1 %v496_v36  ;;  %v458_v36 = vperm.slane %v453_v15, 3 }
  0x6e   :  { %585 = vmatpush.msra.mxu2 %v512_v37  ;;  %605 = vmatpush.msra.mxu3 %v528_v51  ;;  %v621_v51 = vld [vmem:[#allocation13 + $0x8] sm:$0xff] }
  0x6f   :  { %546 = vmatpush.msra.mxu0 %v479_v38  ;;  %566 = vmatpush.msra.mxu1 %v495_v39 }
  0x70   :  { %586 = vmatpush.msra.mxu2 %v511_v40  ;;  %606 = vmatpush.msra.mxu3 %v527_v55 }
  0x71   :  { %547 = vmatpush.msra.mxu0 %v478_v41  ;;  %567 = vmatpush.msra.mxu1 %v494_v42  ;;  %v630_v42 = vld [vmem:[#allocation13 + $0x50] sm:$0xff] }
  0x72   :  { %587 = vmatpush.msra.mxu2 %v510_v46  ;;  %607 = vmatpush.msra.mxu3 %v526_v59  ;;  %v626_v46 = vld [vmem:[#allocation13 + $0x30] sm:$0xff] }
  0x73   :  { %548 = vmatpush.msra.mxu0 %v477_v43  ;;  %568 = vmatpush.msra.mxu1 %v493_v45  ;;  %v629_v43 = vld [vmem:[#allocation13 + $0x48] sm:$0xff]  ;;  %v627_v45 = vld [vmem:[#allocation13 + $0x38] sm:$0xff] }
  0x74   :  { %588 = vmatpush.msra.mxu2 %v509_v50  ;;  %608 = vmatpush.msra.mxu3 %v525_v63  ;;  %v622_v50 = vld [vmem:[#allocation13 + $0x10] sm:$0xff]  ;;  %v693_v63 = vld [vmem:[%s971_s8] ss:$0 sm:$0xff] }
  0x75   :  { %549 = vmatpush.msra.mxu0 %v476_v44  ;;  %569 = vmatpush.msra.mxu1 %v492_v49  ;;  %v628_v44 = vld [vmem:[#allocation13 + $0x40] sm:$0xff]  ;;  %v623_v49 = vld [vmem:[#allocation13 + $0x18] sm:$0xff] }
  0x76   :  { %589 = vmatpush.msra.mxu2 %v508_v54  ;;  %609 = vmatpush.msra.mxu3 %v524_v3 }
  0x77   :  { %550 = vmatpush.msra.mxu0 %v475_v48  ;;  %570 = vmatpush.msra.mxu1 %v491_v53  ;;  %v624_v48 = vld [vmem:[#allocation13 + $0x20] sm:$0xff]  ;;  %v692_v53 = vld [vmem:[%s969_s6] ss:$0 sm:$0xff]  ;;  %s668_s6 = sshll.u32 %s972_s9, 4  ;;  %s669_s6 = int_to_ptr.hbm [resolvable:$true] %s668_s6 }
  0x78   :  { %590 = vmatpush.msra.mxu2 %v507_v58  ;;  %610 = vmatpush.msra.mxu3 %v523_v6 }
  0x79   :  { %551 = vmatpush.msra.mxu0 %v474_v52  ;;  %571 = vmatpush.msra.mxu1 %v490_v57  ;;  %v620_v52 = vld [vmem:[#allocation13] sm:$0xff] }
  0x7a   :  { %591 = vmatpush.msra.mxu2 %v506_v62  ;;  %611 = vmatpush.msra.mxu3 %v522_v8 }
  0x7b   :  { %552 = vmatpush.msra.mxu0 %v473_v56  ;;  %572 = vmatpush.msra.mxu1 %v489_v61 }
  0x7c   :  { %592 = vmatpush.msra.mxu2 %v505_v2  ;;  %612 = vmatpush.msra.mxu3 %v521_v9 }
  0x7d   :  { %553 = vmatpush.msra.mxu0 %v472_v60  ;;  %573 = vmatpush.msra.mxu1 %v488_v1 }
  0x7e   :  { %593 = vmatpush.msra.mxu2 %v504_v5  ;;  %613 = vmatpush.msra.mxu3 %v520_v10 }
  0x7f   :  { %554 = vmatpush.msra.mxu0 %v471_v0  ;;  %574 = vmatpush.msra.mxu1 %v487_v4 }
  0x80   :  { %594 = vmatpush.msra.mxu2 %v503_v7  ;;  %614 = vmatpush.msra.mxu3 %v519_v11 }
  0x81   :  { %640 = vmatpush.msrb.mxu0 %v635_v12 }
  0x83   :  { %641 = vmatpush.msrb.mxu0 %v634_v13 }
  0x85   :  { %642 = vmatpush.msrb.mxu0 %v633_v14 }
  0x87   :  { %643 = vmatpush.msrb.mxu0 %v632_v16 }
  0x89   :  { %644 = vmatpush.msrb.mxu0 %v631_v17 }
  0x8b   :  { %645 = vmatpush.msrb.mxu0 %v630_v42 }
  0x8d   :  { %646 = vmatpush.msrb.mxu0 %v629_v43 }
  0x8f   :  { %647 = vmatpush.msrb.mxu0 %v628_v44 }
  0x91   :  { %648 = vmatpush.msrb.mxu0 %v627_v45 }
  0x93   :  { %649 = vmatpush.msrb.mxu0 %v626_v46 }
  0x95   :  { %650 = vmatpush.msrb.mxu0 %v625_v47 }
  0x97   :  { %651 = vmatpush.msrb.mxu0 %v624_v48 }
  0x99   :  { %652 = vmatpush.msrb.mxu0 %v623_v49 }
  0x9b   :  { %653 = vmatpush.msrb.mxu0 %v622_v50 }
  0x9d   :  { %654 = vmatpush.msrb.mxu0 %v621_v51 }
  0x9f   :  { %655 = vmatpush.msrb.mxu0 %v620_v52 }
  0xd2   :  { %v295_v19 = vpop.f32.mrf.mxu0  ;;  %v315_v20 = vpop.f32.mrf.mxu1 }
  0xd3   :  { %v316_v21 = vadd.f32 %v315_v20, %v295_v19 }
  0xd5   :  { %v463_v22 = vadd.f32 %v455_v18, %v316_v21 }
  0xd7   :  { %v467_v23 = vmax.f32 %v463_v22, 0.0 }
  0xd9   :  { %v335_v25 = vpop.f32.mrf.mxu2  ;;  %v355_v26 = vpop.f32.mrf.mxu3  ;;  %555 = vmatmul.f32.vlgmr.msra.gmra.mxu0 %v467_v23 }
  0xda   :  { %v356_v27 = vadd.f32 %v355_v26, %v335_v25 }
  0xdc   :  { %v464_v29 = vadd.f32 %v456_v24, %v356_v27  ;;  %v375_v30 = vpop.f32.mrf.mxu0  ;;  %v395_v31 = vpop.f32.mrf.mxu1 }
  0xdd   :  { %v396_v32 = vadd.f32 %v395_v31, %v375_v30 }
  0xde   :  { %v468_v33 = vmax.f32 %v464_v29, 0.0 }
  0xdf   :  { %v465_v34 = vadd.f32 %v457_v28, %v396_v32 }
  0xe0   :  { %575 = vmatmul.f32.vlgmr.msra.gmra.mxu1 %v468_v33 }
  0xe1   :  { %v469_v35 = vmax.f32 %v465_v34, 0.0 }
  0xe3   :  { %v415_v37 = vpop.f32.mrf.mxu2  ;;  %v435_v38 = vpop.f32.mrf.mxu3  ;;  %595 = vmatmul.f32.vlgmr.msra.gmra.mxu2 %v469_v35 }
  0xe4   :  { %v436_v39 = vadd.f32 %v435_v38, %v415_v37 }
  0xe6   :  { %v466_v40 = vadd.f32 %v458_v36, %v436_v39 }
  0xe8   :  { %v470_v41 = vmax.f32 %v466_v40, 0.0 }
  0xea   :  { %615 = vmatmul.f32.vlgmr.msra.gmra.mxu3 %v470_v41 }
 0x156   :  { %v556_v54 = vpop.f32.mrf.mxu0 }
 0x157   :  { %v557_v55 = vadd.f32 %v692_v53, %v556_v54 }
 0x15d   :  { %v576_v56 = vpop.f32.mrf.mxu1 }
 0x15e   :  { %v577_v58 = vadd.f32 %v576_v56, %v557_v55 }
 0x166   :  { %v596_v57 = vpop.f32.mrf.mxu2 }
 0x167   :  { %v597_v59 = vadd.f32 %v596_v57, %v577_v58 }
 0x16d   :  { %v616_v60 = vpop.f32.mrf.mxu3 }
 0x16e   :  { %v617_v61 = vadd.f32 %v616_v60, %v597_v59 }
 0x170   :  { %v619_v62 = vmax.f32 %v617_v61, 0.0 }
 0x172   :  { %656 = vmatmul.f32.vlgmr.msrb.gmra.mxu0 %v619_v62 }
 0x1ef   :  { %v657_v0 = vpop.f32.mrf.mxu0 }
 0x1f0   :  { %v658_v1 = vadd.f32 %v693_v63, %v657_v0 }
 0x1f2   :  { %660 = vst [vmem:[#allocation15] sm:$0xff] %v658_v1 }
 0x1f3   :  { %671 = dma.vmem_to_hbm [thread:$0]  %s667_s2, 128, %s669_s6, [#allocation6]  }
 0x1f4   :  { %870 = dma.done.wait [#allocation6], 128  }
 0x1f5   :  { %871 = vsyncadd [#allocation6], 4294967168 }
 0x1f6   :  { %676 = vsyncpa [#allocation5], 1 }
 0x1f7   :  { %677 = vsyncpa [#allocation8], 1 }
 0x1f8   :  { %678 = vsyncpa [#allocation11], 1 }
 0x1f9   :  { %679 = vsyncpa [#allocation14], 1 }
 0x1fa   :  { %680 = vsyncpa [#allocation6], 1 }

</bundles_post_ra>
